<compile_context>
chip_gen: v5e
topology: v5e:2x2
jax: 0.10.0
libtpu: 0.0.40
codegen_flags: <defaults>
</compile_context>

<pallas_src>
import functools
import math

import jax
import jax.numpy as jnp
from jax.experimental import pallas as pl
from jax.experimental.pallas import tpu as pltpu


# --------------------------------------------------------------------------
# Kernel
# --------------------------------------------------------------------------
def t_attn_kernel(u_ref, m_ref, w1t_ref, b1_ref, w2t_ref, b2_ref, w3_ref,
                  b3_ref, uatt_ref, wts_ref, *, compute_bf16):
    Bt, R, E = u_ref.shape
    cdt = jnp.bfloat16 if compute_bf16 else jnp.float32

    u = u_ref[...]                                       # (Bt, R, E) f32 block

    # ---- fc1 over all Bt*R region vectors in one bf16 MXU matmul ----------
    # Reshape while still f32 (8-sublane layout, R=8 keeps it a relabel),
    # then cast to bf16 for the MXU; accumulate in f32.
    u_flat = u.reshape(Bt * R, E)
    pre1 = jnp.dot(u_flat.astype(jnp.bfloat16), w1t_ref[...],
                   preferred_element_type=jnp.float32) + b1_ref[...]
    # tanh on the EUP; bf16 on v6e/v7x halves the dominant (Bt, R, E) scratch.
    W_u = jnp.tanh(pre1.reshape(Bt, R, E).astype(cdt))   # (Bt, R, E)

    # ---- fc2 over the Bt memory vectors ------------------------------------
    pre2 = jnp.dot(m_ref[...].astype(jnp.bfloat16), w2t_ref[...],
                   preferred_element_type=jnp.float32) + b2_ref[...]
    W_um = jnp.tanh(pre2)                                 # (Bt, E) f32

    # ---- fc3 folded into a lane reduce: scores = <W_u, W_um * w3> + b3 -----
    u_vec = (W_um * w3_ref[...]).astype(cdt)              # (Bt, E)
    scores = jnp.sum(W_u * u_vec[:, None, :], axis=-1,
                     dtype=jnp.float32) + b3_ref[0]       # (Bt, R) f32 accum

    # ---- softmax over regions (torch dim=1), EUP approx reciprocal ---------
    smax = jnp.max(scores, axis=-1, keepdims=True)
    e = jnp.exp(scores - smax)
    wts = e * pl.reciprocal(jnp.sum(e, axis=-1, keepdims=True), approx=True)
    wts_ref[...] = wts                                    # (Bt, R)

    # ---- attention-weighted region sum + l2 norm ---------------------------
    # Unrolled over the tiny R axis: reads (Bt, E) slices of the f32 input
    # block, never materializes a (Bt, R, E) f32 product.
    if R <= 32:
        u_att = wts[:, 0:1] * u[:, 0, :]
        for r in range(1, R):
            u_att = u_att + wts[:, r:r + 1] * u[:, r, :]
    else:
        u_att = jnp.sum(wts[:, :, None] * u, axis=1)
    ss = jnp.sum(u_att * u_att, axis=-1, keepdims=True)
    # NOTE: rsqrt with no epsilon -> NaN iff ||u_att|| == 0 (matches the
    # PyTorch reference behavior exactly).
    uatt_ref[...] = u_att * jax.lax.rsqrt(ss)             # (Bt, E) f32


# --------------------------------------------------------------------------
# Wrapper
# --------------------------------------------------------------------------
def _tpu_generation():
    """Best-effort TPU generation from device_kind (5 / 6 / 7)."""
    try:
        kind = jax.devices()[0].device_kind.lower()
    except Exception:
        return 6
    for g in (7, 6, 5, 4):
        if "v%d" % g in kind:
            return g
    return 6


def _choose_batch_tile(B, R, E, gen):
    """Batch rows per grid step, sized by a per-generation VMEM byte budget."""
    wu_bytes = 2 if gen >= 6 else 4
    # Bytes charged per batch row: double-buffered f32 u_t block + bf16 MXU
    # copy + W_u activation + ~10 (Bt, E)-sized f32 temps/outputs.
    per_row = R * E * (2 * 4 + 2 + wu_bytes) + 10 * E * 4
    budget = (3 << 20) if gen <= 6 else (3 << 20) // 2     # ~3 MiB / ~1.5 MiB
    bt = max(1, budget // per_row)
    if bt >= B:
        return B                       # single step: block dims == full dims

    # Align Bt*R to the MXU pass (128 rows on v5e, 256 on v6e/v7x) and Bt
    # itself to the 8-sublane layout of the 2-D (Bt, E) / (Bt, R) blocks.
    mxu_rows = 128 if gen <= 5 else 256
    step = max(8, mxu_rows // math.gcd(R, mxu_rows))
    bt = max(step, (bt // step) * step)
    if bt >= B:
        return B

    if gen >= 7:
        # Two v7x TensorCores shard the ("parallel",) grid axis: prefer an
        # even step count so neither core idles on a tail step.
        n = -(-B // bt)
        if n > 1 and n % 2 == 1:
            bt2 = bt - step
            while bt2 >= step and (-(-B // bt2)) % 2 == 1:
                bt2 -= step
            if bt2 >= step:
                bt = bt2
    return bt


def prepare_params(params):
    """Hoist per-call weight transposes / casts (params are static)."""
    E = params["fc1_w"].shape[0]
    f32 = jnp.float32
    return dict(
        w1t=jnp.asarray(params["fc1_w"], f32).T.astype(jnp.bfloat16),  # (in, out)
        b1=jnp.asarray(params["fc1_b"], f32).reshape(1, E),
        w2t=jnp.asarray(params["fc2_w"], f32).T.astype(jnp.bfloat16),
        b2=jnp.asarray(params["fc2_b"], f32).reshape(1, E),
        w3=jnp.asarray(params["fc3_w"], f32).reshape(1, E),             # fc3 row
        b3=jnp.asarray(params["fc3_b"], f32).reshape(1),
    )


def t_single_modal_atten(u_t, m_u, prep):
    B, R, E = u_t.shape
    assert m_u.shape == (B, E)

    gen = _tpu_generation()
    Bt = _choose_batch_tile(B, R, E, gen)
    n_blk = -(-B // Bt)   # ragged last tile handled by the pipeline (OOB
                          # input rows are row-local garbage, OOB output rows
                          # are dropped on write-back).

    # Inputs go in at native f32; bf16 cast for the MXU happens in-kernel.
    u_t = u_t.astype(jnp.float32)
    m_u = m_u.astype(jnp.float32)

    def _const_spec(shape):
        idx = (lambda i: (0, 0))
        # Pin large constant weights to a single VMEM buffer on v7x (64 MiB
        # physical VMEM): the constant index_map already avoids re-DMA,
        # Buffered(1) drops the second buffer so the VMEM goes to a larger Bt.
        if gen >= 7 and len(shape) == 2 and shape[0] * shape[1] >= 512 * 512:
            try:
                return pl.BlockSpec(shape, idx, pipeline_mode=pl.Buffered(1))
            except Exception:
                pass
        return pl.BlockSpec(shape, idx)

    grid_spec = pltpu.PrefetchScalarGridSpec(
        num_scalar_prefetch=0,
        grid=(n_blk,),
        in_specs=[
            pl.BlockSpec((Bt, R, E), lambda i: (i, 0, 0)),    # u_t tile (f32)
            pl.BlockSpec((Bt, E), lambda i: (i, 0)),          # m_u tile (f32)
            _const_spec((E, E)),                              # W1^T (bf16)
            _const_spec((1, E)),                              # b1
            _const_spec((E, E)),                              # W2^T (bf16)
            _const_spec((1, E)),                              # b2
            _const_spec((1, E)),                              # fc3 weight row
            pl.BlockSpec(memory_space=pltpu.SMEM),            # b3 scalar
        ],
        out_specs=[
            pl.BlockSpec((Bt, E), lambda i: (i, 0)),          # u_att
            pl.BlockSpec((Bt, R), lambda i: (i, 0)),          # weights
        ],
    )

    kernel = functools.partial(t_attn_kernel, compute_bf16=(gen >= 6))
    u_att, wts = pl.pallas_call(
        kernel,
        out_shape=(
            jax.ShapeDtypeStruct((B, E), jnp.float32),
            jax.ShapeDtypeStruct((B, R), jnp.float32),
        ),
        grid_spec=grid_spec,
        compiler_params=pltpu.CompilerParams(
            dimension_semantics=("parallel",),
            vmem_limit_bytes=(40 << 20) if gen >= 7 else (64 << 20),
        ),
    )(u_t, m_u, prep["w1t"], prep["b1"], prep["w2t"], prep["b2"],
      prep["w3"], prep["b3"])
    return u_att, wts


# --------------------------------------------------------------------------
# Reference / test harness
# --------------------------------------------------------------------------
def init_params(key, embed_dim):
    # Deterministic torch-Linear-style init: U(-1/sqrt(fan_in), 1/sqrt(fan_in)).
    ks = jax.random.split(key, 6)

    def lin(kw, kb, fan_in, fan_out):
        bound = 1.0 / float(fan_in) ** 0.5
        w = jax.random.uniform(kw, (fan_out, fan_in), jnp.float32, -bound, bound)
        b = jax.random.uniform(kb, (fan_out,), jnp.float32, -bound, bound)
        return w, b

    fc1_w, fc1_b = lin(ks[0], ks[1], embed_dim, embed_dim)
    fc2_w, fc2_b = lin(ks[2], ks[3], embed_dim, embed_dim)
    fc3_w, fc3_b = lin(ks[4], ks[5], embed_dim, 1)
    return dict(fc1_w=fc1_w, fc1_b=fc1_b, fc2_w=fc2_w, fc2_b=fc2_b,
                fc3_w=fc3_w, fc3_b=fc3_b)


def reference_forward(u_t, m_u, p):
    W_u = jnp.tanh(u_t @ p["fc1_w"].T + p["fc1_b"])                 # (B,R,E)
    W_um = jnp.tanh(m_u @ p["fc2_w"].T + p["fc2_b"])                # (B,E)
    h_u = W_u * W_um[:, None, :]
    a_u = (h_u @ p["fc3_w"].T + p["fc3_b"])[..., 0]                 # (B,R)
    w = jax.nn.softmax(a_u, axis=1)
    u_att = jnp.sum(w[:, :, None] * u_t, axis=1)                    # (B,E)
    u_att = u_att / jnp.sqrt(jnp.sum(u_att ** 2, axis=-1, keepdims=True))
    return u_att, w


if __name__ == "__main__":
    B, R = 2, 8                 # batch, num_regions (words)
    embed_dim = 32

    key = jax.random.PRNGKey(0)
    k_u, k_m, k_p = jax.random.split(key, 3)
    u_t = jax.random.normal(k_u, (B, R, embed_dim), jnp.float32)
    m_u = jax.random.normal(k_m, (B, embed_dim), jnp.float32)
    params = init_params(k_p, embed_dim)
    prep = prepare_params(params)           # hoisted weight transposes/casts

    fwd = jax.jit(t_single_modal_atten)
    u_att, weights = fwd(u_t, m_u, prep)
    jax.block_until_ready((u_att, weights))

    u_att_ref, w_ref = reference_forward(u_t, m_u, params)
    assert u_att.shape == (B, embed_dim) and weights.shape == (B, R)
    assert jnp.allclose(u_att, u_att_ref, atol=3e-2, rtol=3e-2)
    assert jnp.allclose(weights, w_ref, atol=3e-2, rtol=3e-2)

    print("KERNEL_OK")
</pallas_src>

<mosaic_0001>
module attributes {stable_mosaic.version = 11 : i64} {
  func.func @t_attn_kernel(%arg0: i32, %arg1: memref<2x8x32xf32, #tpu.memory_space<vmem>>, %arg2: memref<2x32xf32, #tpu.memory_space<vmem>>, %arg3: memref<32x32xbf16, #tpu.memory_space<vmem>>, %arg4: memref<1x32xf32, #tpu.memory_space<vmem>>, %arg5: memref<32x32xbf16, #tpu.memory_space<vmem>>, %arg6: memref<1x32xf32, #tpu.memory_space<vmem>>, %arg7: memref<1x32xf32, #tpu.memory_space<vmem>>, %arg8: memref<1xf32, #tpu.memory_space<smem>>, %arg9: memref<2x32xf32, #tpu.memory_space<vmem>>, %arg10: memref<2x8xf32, #tpu.memory_space<vmem>>) attributes {dimension_semantics = [#tpu.dimension_semantics<parallel>], iteration_bounds = array<i64: 1>, scalar_prefetch = 0 : i64, scratch_operands = 0 : i64, tpu.core_type = #tpu.core_type<tc>, window_params = [{transform_indices = @transform_0, window_bounds = array<i64: 2, 8, 32>}, {transform_indices = @transform_1, window_bounds = array<i64: 2, 32>}, {pipeline_mode = #tpu.pipeline_mode<synchronous>, transform_indices = @transform_2, window_bounds = array<i64: 32, 32>}, {pipeline_mode = #tpu.pipeline_mode<synchronous>, transform_indices = @transform_3, window_bounds = array<i64: 1, 32>}, {pipeline_mode = #tpu.pipeline_mode<synchronous>, transform_indices = @transform_4, window_bounds = array<i64: 32, 32>}, {pipeline_mode = #tpu.pipeline_mode<synchronous>, transform_indices = @transform_5, window_bounds = array<i64: 1, 32>}, {pipeline_mode = #tpu.pipeline_mode<synchronous>, transform_indices = @transform_6, window_bounds = array<i64: 1, 32>}, {transform_indices = @transform_7, window_bounds = array<i64: 1>}, {transform_indices = @transform_8, window_bounds = array<i64: 2, 32>}, {transform_indices = @transform_9, window_bounds = array<i64: 2, 8>}]} {
    %c0 = arith.constant 0 : index
    %c0_0 = arith.constant 0 : index
    %c0_1 = arith.constant 0 : index
    %0 = vector.load %arg1[%c0, %c0_0, %c0_1] : memref<2x8x32xf32, #tpu.memory_space<vmem>>, vector<2x8x32xf32>
    %1 = vector.shape_cast %0 : vector<2x8x32xf32> to vector<16x32xf32>
    %2 = arith.truncf %1 : vector<16x32xf32> to vector<16x32xbf16>
    %c0_2 = arith.constant 0 : index
    %c0_3 = arith.constant 0 : index
    %3 = vector.load %arg3[%c0_2, %c0_3] : memref<32x32xbf16, #tpu.memory_space<vmem>>, vector<32x32xbf16>
    %cst = arith.constant dense<0.000000e+00> : vector<16x32xf32>
    %4 = tpu.matmul %2, %3, %cst {dimension_numbers = #tpu.dot_dimension_numbers<[1], [0], [0], [1], [0, 0, 1, 1], [], []>} : vector<16x32xbf16>, vector<32x32xbf16>, vector<16x32xf32> -> vector<16x32xf32>
    %c0_4 = arith.constant 0 : index
    %c0_5 = arith.constant 0 : index
    %5 = vector.load %arg4[%c0_4, %c0_5] : memref<1x32xf32, #tpu.memory_space<vmem>>, vector<1x32xf32>
    %6 = vector.broadcast %5 : vector<1x32xf32> to vector<16x32xf32>
    %7 = arith.addf %4, %6 : vector<16x32xf32>
    %8 = vector.shape_cast %7 : vector<16x32xf32> to vector<2x8x32xf32>
    %9 = arith.truncf %8 : vector<2x8x32xf32> to vector<2x8x32xbf16>
    %10 = math.tanh %9 : vector<2x8x32xbf16>
    %c0_6 = arith.constant 0 : index
    %c0_7 = arith.constant 0 : index
    %11 = vector.load %arg2[%c0_6, %c0_7] : memref<2x32xf32, #tpu.memory_space<vmem>>, vector<2x32xf32>
    %12 = arith.truncf %11 : vector<2x32xf32> to vector<2x32xbf16>
    %c0_8 = arith.constant 0 : index
    %c0_9 = arith.constant 0 : index
    %13 = vector.load %arg5[%c0_8, %c0_9] : memref<32x32xbf16, #tpu.memory_space<vmem>>, vector<32x32xbf16>
    %cst_10 = arith.constant dense<0.000000e+00> : vector<2x32xf32>
    %14 = tpu.matmul %12, %13, %cst_10 {dimension_numbers = #tpu.dot_dimension_numbers<[1], [0], [0], [1], [0, 0, 1, 1], [], []>} : vector<2x32xbf16>, vector<32x32xbf16>, vector<2x32xf32> -> vector<2x32xf32>
    %c0_11 = arith.constant 0 : index
    %c0_12 = arith.constant 0 : index
    %15 = vector.load %arg6[%c0_11, %c0_12] : memref<1x32xf32, #tpu.memory_space<vmem>>, vector<1x32xf32>
    %16 = vector.broadcast %15 : vector<1x32xf32> to vector<2x32xf32>
    %17 = arith.addf %14, %16 : vector<2x32xf32>
    %18 = math.tanh %17 : vector<2x32xf32>
    %c0_13 = arith.constant 0 : index
    %c0_14 = arith.constant 0 : index
    %19 = vector.load %arg7[%c0_13, %c0_14] : memref<1x32xf32, #tpu.memory_space<vmem>>, vector<1x32xf32>
    %20 = vector.broadcast %19 : vector<1x32xf32> to vector<2x32xf32>
    %21 = arith.mulf %18, %20 : vector<2x32xf32>
    %22 = arith.truncf %21 : vector<2x32xf32> to vector<2x32xbf16>
    %23 = vector.shape_cast %22 : vector<2x32xbf16> to vector<2x1x32xbf16>
    %24 = vector.broadcast %23 : vector<2x1x32xbf16> to vector<2x8x32xbf16>
    %25 = arith.mulf %10, %24 : vector<2x8x32xbf16>
    %26 = arith.extf %25 : vector<2x8x32xbf16> to vector<2x8x32xf32>
    %cst_15 = arith.constant dense<0.000000e+00> : vector<2x8xf32>
    %27 = vector.multi_reduction <add>, %26, %cst_15 [2] : vector<2x8x32xf32> to vector<2x8xf32>
    %c0_16 = arith.constant 0 : index
    %28 = memref.load %arg8[%c0_16] : memref<1xf32, #tpu.memory_space<smem>>
    %29 = vector.broadcast %28 : f32 to vector<2x8xf32>
    %30 = arith.addf %27, %29 : vector<2x8xf32>
    %cst_17 = arith.constant dense<0xFF800000> : vector<2xf32>
    %31 = vector.multi_reduction <maximumf>, %30, %cst_17 [1] : vector<2x8xf32> to vector<2xf32>
    %32 = vector.shape_cast %31 : vector<2xf32> to vector<2x1xf32>
    %33 = vector.broadcast %32 : vector<2x1xf32> to vector<2x8xf32>
    %34 = arith.subf %30, %33 : vector<2x8xf32>
    %35 = math.exp %34 : vector<2x8xf32>
    %cst_18 = arith.constant dense<0.000000e+00> : vector<2xf32>
    %36 = vector.multi_reduction <add>, %35, %cst_18 [1] : vector<2x8xf32> to vector<2xf32>
    %37 = vector.shape_cast %36 : vector<2xf32> to vector<2x1xf32>
    %38 = tpu.reciprocal %37 {approx = true} : vector<2x1xf32> -> vector<2x1xf32>
    %39 = vector.broadcast %38 : vector<2x1xf32> to vector<2x8xf32>
    %40 = arith.mulf %35, %39 : vector<2x8xf32>
    %c0_19 = arith.constant 0 : index
    %c0_20 = arith.constant 0 : index
    %41 = vector.load %arg10[%c0_19, %c0_20] : memref<2x8xf32, #tpu.memory_space<vmem>>, vector<2x8xf32>
    tpu.vector_store %arg10[%c0_19, %c0_20], %40 {strides = array<i32>} : memref<2x8xf32, #tpu.memory_space<vmem>>, vector<2x8xf32>,
    %42 = vector.extract_strided_slice %40 {offsets = [0, 0], sizes = [2, 1], strides = [1, 1]} : vector<2x8xf32> to vector<2x1xf32>
    %43 = vector.extract_strided_slice %0 {offsets = [0, 0, 0], sizes = [2, 1, 32], strides = [1, 1, 1]} : vector<2x8x32xf32> to vector<2x1x32xf32>
    %44 = vector.shape_cast %43 : vector<2x1x32xf32> to vector<2x32xf32>
    %45 = vector.broadcast %42 : vector<2x1xf32> to vector<2x32xf32>
    %46 = arith.mulf %45, %44 : vector<2x32xf32>
    %47 = vector.extract_strided_slice %40 {offsets = [0, 1], sizes = [2, 1], strides = [1, 1]} : vector<2x8xf32> to vector<2x1xf32>
    %48 = vector.extract_strided_slice %0 {offsets = [0, 1, 0], sizes = [2, 1, 32], strides = [1, 1, 1]} : vector<2x8x32xf32> to vector<2x1x32xf32>
    %49 = vector.shape_cast %48 : vector<2x1x32xf32> to vector<2x32xf32>
    %50 = vector.broadcast %47 : vector<2x1xf32> to vector<2x32xf32>
    %51 = arith.mulf %50, %49 : vector<2x32xf32>
    %52 = arith.addf %46, %51 : vector<2x32xf32>
    %53 = vector.extract_strided_slice %40 {offsets = [0, 2], sizes = [2, 1], strides = [1, 1]} : vector<2x8xf32> to vector<2x1xf32>
    %54 = vector.extract_strided_slice %0 {offsets = [0, 2, 0], sizes = [2, 1, 32], strides = [1, 1, 1]} : vector<2x8x32xf32> to vector<2x1x32xf32>
    %55 = vector.shape_cast %54 : vector<2x1x32xf32> to vector<2x32xf32>
    %56 = vector.broadcast %53 : vector<2x1xf32> to vector<2x32xf32>
    %57 = arith.mulf %56, %55 : vector<2x32xf32>
    %58 = arith.addf %52, %57 : vector<2x32xf32>
    %59 = vector.extract_strided_slice %40 {offsets = [0, 3], sizes = [2, 1], strides = [1, 1]} : vector<2x8xf32> to vector<2x1xf32>
    %60 = vector.extract_strided_slice %0 {offsets = [0, 3, 0], sizes = [2, 1, 32], strides = [1, 1, 1]} : vector<2x8x32xf32> to vector<2x1x32xf32>
    %61 = vector.shape_cast %60 : vector<2x1x32xf32> to vector<2x32xf32>
    %62 = vector.broadcast %59 : vector<2x1xf32> to vector<2x32xf32>
    %63 = arith.mulf %62, %61 : vector<2x32xf32>
    %64 = arith.addf %58, %63 : vector<2x32xf32>
    %65 = vector.extract_strided_slice %40 {offsets = [0, 4], sizes = [2, 1], strides = [1, 1]} : vector<2x8xf32> to vector<2x1xf32>
    %66 = vector.extract_strided_slice %0 {offsets = [0, 4, 0], sizes = [2, 1, 32], strides = [1, 1, 1]} : vector<2x8x32xf32> to vector<2x1x32xf32>
    %67 = vector.shape_cast %66 : vector<2x1x32xf32> to vector<2x32xf32>
    %68 = vector.broadcast %65 : vector<2x1xf32> to vector<2x32xf32>
    %69 = arith.mulf %68, %67 : vector<2x32xf32>
    %70 = arith.addf %64, %69 : vector<2x32xf32>
    %71 = vector.extract_strided_slice %40 {offsets = [0, 5], sizes = [2, 1], strides = [1, 1]} : vector<2x8xf32> to vector<2x1xf32>
    %72 = vector.extract_strided_slice %0 {offsets = [0, 5, 0], sizes = [2, 1, 32], strides = [1, 1, 1]} : vector<2x8x32xf32> to vector<2x1x32xf32>
    %73 = vector.shape_cast %72 : vector<2x1x32xf32> to vector<2x32xf32>
    %74 = vector.broadcast %71 : vector<2x1xf32> to vector<2x32xf32>
    %75 = arith.mulf %74, %73 : vector<2x32xf32>
    %76 = arith.addf %70, %75 : vector<2x32xf32>
    %77 = vector.extract_strided_slice %40 {offsets = [0, 6], sizes = [2, 1], strides = [1, 1]} : vector<2x8xf32> to vector<2x1xf32>
    %78 = vector.extract_strided_slice %0 {offsets = [0, 6, 0], sizes = [2, 1, 32], strides = [1, 1, 1]} : vector<2x8x32xf32> to vector<2x1x32xf32>
    %79 = vector.shape_cast %78 : vector<2x1x32xf32> to vector<2x32xf32>
    %80 = vector.broadcast %77 : vector<2x1xf32> to vector<2x32xf32>
    %81 = arith.mulf %80, %79 : vector<2x32xf32>
    %82 = arith.addf %76, %81 : vector<2x32xf32>
    %83 = vector.extract_strided_slice %40 {offsets = [0, 7], sizes = [2, 1], strides = [1, 1]} : vector<2x8xf32> to vector<2x1xf32>
    %84 = vector.extract_strided_slice %0 {offsets = [0, 7, 0], sizes = [2, 1, 32], strides = [1, 1, 1]} : vector<2x8x32xf32> to vector<2x1x32xf32>
    %85 = vector.shape_cast %84 : vector<2x1x32xf32> to vector<2x32xf32>
    %86 = vector.broadcast %83 : vector<2x1xf32> to vector<2x32xf32>
    %87 = arith.mulf %86, %85 : vector<2x32xf32>
    %88 = arith.addf %82, %87 : vector<2x32xf32>
    %89 = arith.mulf %88, %88 : vector<2x32xf32>
    %cst_21 = arith.constant dense<0.000000e+00> : vector<2xf32>
    %90 = vector.multi_reduction <add>, %89, %cst_21 [1] : vector<2x32xf32> to vector<2xf32>
    %91 = vector.shape_cast %90 : vector<2xf32> to vector<2x1xf32>
    %92 = math.rsqrt %91 : vector<2x1xf32>
    %93 = vector.broadcast %92 : vector<2x1xf32> to vector<2x32xf32>
    %94 = arith.mulf %88, %93 : vector<2x32xf32>
    %c0_22 = arith.constant 0 : index
    %c0_23 = arith.constant 0 : index
    %95 = vector.load %arg9[%c0_22, %c0_23] : memref<2x32xf32, #tpu.memory_space<vmem>>, vector<2x32xf32>
    tpu.vector_store %arg9[%c0_22, %c0_23], %94 {strides = array<i32>} : memref<2x32xf32, #tpu.memory_space<vmem>>, vector<2x32xf32>,
    return
  }
  func.func @transform_0(%arg0: i32) -> (i32, i32, i32) {
    %c0_i32 = arith.constant 0 : i32
    %c0_i32_0 = arith.constant 0 : i32
    %c0_i32_1 = arith.constant 0 : i32
    return %arg0, %c0_i32, %c0_i32_0 : i32, i32, i32
  }
  func.func @transform_1(%arg0: i32) -> (i32, i32) {
    %c0_i32 = arith.constant 0 : i32
    %c0_i32_0 = arith.constant 0 : i32
    return %arg0, %c0_i32 : i32, i32
  }
  func.func @transform_2(%arg0: i32) -> (i32, i32) {
    %c0_i32 = arith.constant 0 : i32
    %c0_i32_0 = arith.constant 0 : i32
    %c0_i32_1 = arith.constant 0 : i32
    return %c0_i32, %c0_i32_0 : i32, i32
  }
  func.func @transform_3(%arg0: i32) -> (i32, i32) {
    %c0_i32 = arith.constant 0 : i32
    %c0_i32_0 = arith.constant 0 : i32
    %c0_i32_1 = arith.constant 0 : i32
    return %c0_i32, %c0_i32_0 : i32, i32
  }
  func.func @transform_4(%arg0: i32) -> (i32, i32) {
    %c0_i32 = arith.constant 0 : i32
    %c0_i32_0 = arith.constant 0 : i32
    %c0_i32_1 = arith.constant 0 : i32
    return %c0_i32, %c0_i32_0 : i32, i32
  }
  func.func @transform_5(%arg0: i32) -> (i32, i32) {
    %c0_i32 = arith.constant 0 : i32
    %c0_i32_0 = arith.constant 0 : i32
    %c0_i32_1 = arith.constant 0 : i32
    return %c0_i32, %c0_i32_0 : i32, i32
  }
  func.func @transform_6(%arg0: i32) -> (i32, i32) {
    %c0_i32 = arith.constant 0 : i32
    %c0_i32_0 = arith.constant 0 : i32
    %c0_i32_1 = arith.constant 0 : i32
    return %c0_i32, %c0_i32_0 : i32, i32
  }
  func.func @transform_7(%arg0: i32) -> i32 {
    %c0_i32 = arith.constant 0 : i32
    %c0_i32_0 = arith.constant 0 : i32
    return %c0_i32 : i32
  }
  func.func @transform_8(%arg0: i32) -> (i32, i32) {
    %c0_i32 = arith.constant 0 : i32
    %c0_i32_0 = arith.constant 0 : i32
    return %arg0, %c0_i32 : i32, i32
  }
  func.func @transform_9(%arg0: i32) -> (i32, i32) {
    %c0_i32 = arith.constant 0 : i32
    %c0_i32_0 = arith.constant 0 : i32
    return %arg0, %c0_i32 : i32, i32
  }
}

</mosaic_0001>

<bundles_post_ra>
// kernel: t_single_modal_atten.1
= control target key start
LH: loop header
LB: loop body
LE: loop exit
PB: predicated region body
PF: predicated region fallthrough
CT: control target
= control target key end

     0   :  { %16 = vsyncpa [#allocation4], 0  ;;  %s1913_s0 = inlined_call_operand.hbm [shape: f32[2,8,32], index: 0, kind: input, shape index: {}]   ;;  %s1914_s1 = inlined_call_operand.vmem [shape: f32[2,32], index: 1, kind: input, shape index: {}]   ;;  %s1915_s2 = inlined_call_operand.hbm [shape: bf16[32,32], index: 2, kind: input, shape index: {}]   ;;  %s1916_s3 = inlined_call_operand.vmem [shape: f32[1,32], index: 3, kind: input, shape index: {}]   ;;  %s1917_s4 = inlined_call_operand.hbm [shape: bf16[32,32], index: 4, kind: input, shape index: {}]   ;;  %s1918_s5 = inlined_call_operand.vmem [shape: f32[1,32], index: 5, kind: input, shape index: {}]   ;;  %s1919_s6 = inlined_call_operand.vmem [shape: f32[1,32], index: 6, kind: input, shape index: {}]   ;;  %s1920_s7 = inlined_call_operand.<no memory space> [shape: f32[1], index: 7, kind: input, shape index: {}]   ;;  %s1921_s8 = inlined_call_operand.hbm [shape: f32[2,32], index: 8, kind: output, shape index: {0}]   ;;  %s1922_s9 = inlined_call_operand.hbm [shape: f32[2,8], index: 9, kind: output, shape index: {1}]  }
   0x1   :  { %17 = vsyncpa [#allocation7], 0 }
   0x2   :  { %18 = vsyncpa [#allocation5], 0  ;;  %s39_s11 = sshll.u32 %s1915_s2, 4  ;;  %s40_s11 = int_to_ptr.hbm [resolvable:$true] %s39_s11 }
   0x3   :  { %19 = vsyncpa [#allocation11], 0  ;;  %s1287_s12 = smov [#allocation6]   ;;  %s24_s16 = sshll.u32 %s1913_s0, 4  ;;  %s25_s16 = int_to_ptr.hbm [resolvable:$true] %s24_s16 }
   0x4   :  { %s41_s13 = sshll.u32 %s1287_s12, 4  ;;  %s1288_s17 = smov 64   ;;  %s42_s13 = int_to_ptr.vmem [resolvable:$true] %s41_s13 }
   0x5   :  { %s1289_s18 = smov 4   ;;  %s1290_s19 = smov [#allocation3]  }
   0x6   :  { %47 = dma.hbm_to_vmem [thread:$0]  %s40_s11, 256, %s42_s13, [#allocation7], %s1288_s17, %s1288_s17, %s1289_s18  }
   0x7   :  { %s26_s20 = sshll.u32 %s1290_s19, 4  ;;  %s1291_s21 = smov 128   ;;  %s27_s20 = int_to_ptr.vmem [resolvable:$true] %s26_s20 }
   0x8   :  { %s1292_s22 = smov 8   ;;  %s54_s24 = sshll.u32 %s1917_s4, 4  ;;  %s55_s24 = int_to_ptr.hbm [resolvable:$true] %s54_s24 }
   0x9   :  { %32 = dma.hbm_to_vmem [thread:$0]  %s25_s16, 256, %s27_s20, [#allocation4], %s1291_s21, %s1291_s21, %s1292_s22  }
   0xa   :  { %s1293_s25 = smov [#allocation8]  }
   0xb   :  { %s56_s26 = sshll.u32 %s1293_s25, 4  ;;  %s57_s26 = int_to_ptr.vmem [resolvable:$true] %s56_s26 }
   0xc   :  { %62 = dma.hbm_to_vmem [thread:$0]  %s55_s24, 256, %s57_s26, [#allocation7], %s1288_s17, %s1288_s17, %s1289_s18  }
   0xd   :  { %1279 = dma.done.wait [#allocation4], 256  }
   0xe   :  { %1280 = vsyncadd [#allocation4], 4294967040 }
   0xf   :  { %1281 = dma.done.wait [#allocation7], 512  }
  0x10   :  { %1282 = vsyncadd [#allocation7], 4294966784  ;;  %v219_v0 = vlaneseq  ;;  %v1073_v2 = vld [vmem:[#allocation8 + $0x8] sm:$0xff]  ;;  %v1071_v3 = vld [vmem:[#allocation6 + $0x8] sm:$0xff]  ;;  %vm105_vm0 = vcmask 261120   ;;  %vm178_vm1 = vcmask 1040384  }
  0x11   :  { %v1072_v4 = vld [vmem:[#allocation8] sm:$0xff]  ;;  %v1070_v5 = vld [vmem:[#allocation6] sm:$0xff]  ;;  %162 = vmatpush.bf16.msra.mxu1 %v1073_v2  ;;  %115 = vmatpush.bf16.msra.mxu0 %v1071_v3  ;;  %v1365_v8 = vld [vmem:[#allocation3 + $0x8] sm:$0xff]  ;;  %vm223_vm2 = vcmask 1041409   ;;  %vm226_vm3 = vcmask 58368   ;;  %vm922_vm4 = vcmask 130112  }
  0x12   :  { %v1357_v1 = vshrl.u32 %v219_v0, 7  ;;  %v131_v6 = vld [vmem:[%s1914_s1] sm:$0x3]  ;;  %v1386_v14 = vperm.slane %v1365_v8, 0  ;;  %v374_v17 = vperm.slane %v1365_v8, 1  ;;  %v1431_v28 = vperm.slane %v1365_v8, 2 }
  0x13   :  { %v1363_v7 = vld [vmem:[#allocation3] sm:$0xff]  ;;  %v132_v10 = vpack.c.bf16 %v131_v6, %v131_v6  ;;  %v526_v3 = vperm.slane %v1365_v8, 3  ;;  %vm926_vm5 = vcmask 195712   ;;  %vm930_vm6 = vcmask 261312   ;;  %s1035_s13 = sshll.u32 %s1922_s9, 4  ;;  %s1296_s9 = smov [#allocation9]   ;;  %s1036_s13 = int_to_ptr.hbm [resolvable:$true] %s1035_s13 }
  0x14   :  { %1084 = vset.pattern.permute.xlu1 %v1357_v1  ;;  %v1368_v9 = vperm.slane %v1363_v7, 0  ;;  %v84_v11 = vpack.c.bf16 %v1365_v8, %v1363_v7  ;;  %v1376_v12 = vadd.s32 8, %v1357_v1  ;;  %v1381_v13 = vadd.s32 24, %v1357_v1  ;;  %v1142_v19 = vld [vmem:[%s1918_s5] ss:$0 sm:$0xff]  ;;  %s1022_s14 = sshll.u32 %s1296_s9, 4  ;;  %s1023_s14 = int_to_ptr.vmem [resolvable:$true] %s1022_s14 }
  0x15   :  { %163 = vmatpush.bf16.msra.mxu1 %v1072_v4  ;;  %116 = vmatpush.bf16.msra.mxu0 %v1070_v5  ;;  %v1390_v15 = vadd.s32 16, %v1357_v1  ;;  %v1399_v16 = vperm.slane %v1363_v7, 1  ;;  %v1415_v18 = vperm.slane %v1363_v7, 2  ;;  %v1144_v20 = vld [vmem:[%s1916_s3] ss:$0 sm:$0xff]  ;;  %v501_v63 = vperm.slane %v1363_v7, 3 }
  0x16   :  { %1087 = vset.pattern.permute.xlu0 %v1381_v13  ;;  %v1143_v26 = vld [vmem:[%s1919_s6] ss:$0 sm:$0xff]  ;;  %v577_v4 = vperm.slane %v1363_v7, 4  ;;  %v602_v5 = vperm.slane %v1365_v8, 4  ;;  %v1463_v6 = vperm.slane %v1363_v7, 5  ;;  %vm941_vm7 = vcmask 254976  }
  0x17   :  { %1086 = vset.pattern.permute.xlu2 %v1390_v15  ;;  %s1295_s6 = smov [#allocation10]   ;;  %s1024_s17 = sshll.u32 %s1921_s8, 4  ;;  %s1025_s17 = int_to_ptr.hbm [resolvable:$true] %s1024_s17 }
  0x18   :  { %1068 = vmatmul.msk.bf16.vlgmr.msra.gmra.mxu1 %vm105_vm0, %v132_v10  ;;  %1059 = vmatmul.msk.bf16.vlgmr.msra.gmra.mxu0 %vm105_vm0, %v84_v11  ;;  %v214_v11 = vstv %s1920_s7  ;;  %s1033_s7 = sshll.u32 %s1295_s6, 4  ;;  %s1034_s7 = int_to_ptr.vmem [resolvable:$true] %s1033_s7 }
  0x1c   :  { %286 = vperm.xlu1 %1084, %v1368_v9  }
  0x1f   :  { %298 = vperm.xlu2 %1086, %v1368_v9  }
  0x24   :  { %1085 = vset.pattern.permute.xlu1 %v1376_v12 }
  0x27   :  { %1091 = vset.pattern.permute.xlu2 %v1357_v1 }
  0x2c   :  { %292 = vperm.xlu1 %1085, %v1368_v9  }
  0x2f   :  { %354 = vperm.xlu2 %1091, %v1399_v16  }
  0x34   :  { %1088 = vset.pattern.permute.xlu1 %v1357_v1 }
  0x37   :  { %1093 = vset.pattern.permute.xlu2 %v1390_v15 }
  0x3c   :  { %311 = vperm.xlu1 %1088, %v1386_v14  }
  0x3f   :  { %366 = vperm.xlu2 %1093, %v1399_v16  }
  0x44   :  { %1089 = vset.pattern.permute.xlu1 %v1376_v12 }
  0x47   :  { %1095 = vset.pattern.permute.xlu2 %v1376_v12 }
  0x4c   :  { %317 = vperm.xlu1 %1089, %v1386_v14  }
  0x4f   :  { %385 = vperm.xlu2 %1095, %v374_v17  }
  0x54   :  { %1090 = vset.pattern.permute.xlu1 %v1381_v13 }
  0x57   :  { %1097 = vset.pattern.permute.xlu2 %v1381_v13 }
  0x5c   :  { %329 = vperm.xlu1 %1090, %v1386_v14  }
  0x5f   :  { %397 = vperm.xlu2 %1097, %v374_v17  }
  0x64   :  { %1092 = vset.pattern.permute.xlu1 %v1376_v12 }
  0x67   :  { %1099 = vset.pattern.permute.xlu2 %v1390_v15 }
  0x6c   :  { %360 = vperm.xlu1 %1092, %v1399_v16  }
  0x6f   :  { %442 = vperm.xlu2 %1099, %v1415_v18  }
  0x74   :  { %1094 = vset.pattern.permute.xlu1 %v1357_v1 }
  0x77   :  { %1101 = vset.pattern.permute.xlu2 %v1357_v1 }
  0x7c   :  { %379 = vperm.xlu1 %1094, %v374_v17  }
  0x7f   :  { %455 = vperm.xlu2 %1101, %v1431_v28  }
  0x84   :  { %1096 = vset.pattern.permute.xlu1 %v1390_v15 }
  0x87   :  { %1103 = vset.pattern.permute.xlu2 %v1381_v13 }
  0x8c   :  { %391 = vperm.xlu1 %1096, %v374_v17  }
  0x8e   :  { %v1466_v10 = vpop.permute.xlu1 %286 }
  0x8f   :  { %473 = vperm.xlu2 %1103, %v1431_v28  }
  0x94   :  { %1098 = vset.pattern.permute.xlu1 %v1376_v12 }
  0x95   :  { %v165_v21 = vpop.f32.mrf.mxu1  ;;  %v118_v22 = vpop.f32.mrf.mxu0 }
  0x96   :  { %v166_v23 = vadd.f32 %v1142_v19, %v165_v21  ;;  %v119_v24 = vadd.f32 %v1144_v20, %v118_v22 }
  0x97   :  { %1105 = vset.pattern.permute.xlu2 %v1376_v12 }
  0x98   :  { %1145 = vtanh.f32 %v166_v23  ;;  %v123_v25 = vpack.c.bf16 %v119_v24, %v119_v24  ;;  %v1483_v23 = vperm.slane %v1365_v8, 5 }
  0x9a   :  { %v125_v27 = vunpack.c.l.bf16 %v123_v25 }
  0x9c   :  { %436 = vperm.xlu1 %1098, %v1415_v18   ;;  %1147 = vtanh.f32 %v125_v27 }
  0x9d   :  { %v167_v29 = vpop.f32.mrf.mxu1  ;;  %v120_v30 = vpop.f32.mrf.mxu0 }
  0x9e   :  { %v1146_v31 = vpop.eup %1145  ;;  %v121_v32 = vadd.f32 %v1144_v20, %v120_v30  ;;  %v1477_v20 = vpop.permute.xlu1 %292  ;;  %v1501_v29 = vperm.slane %v1363_v7, 6 }
  0x9f   :  { %v174_v33 = vmul.f32 %v1146_v31, %v1143_v26  ;;  %512 = vperm.xlu2 %1105, %v501_v63   ;;  %v1506_v31 = vperm.slane %v1365_v8, 6 }
  0xa0   :  { %v124_v34 = vpack.c.bf16 %v121_v32, %v121_v32 }
  0xa1   :  { %v175_v35 = vpack.c.bf16 %v174_v33, %v174_v33 }
  0xa2   :  { %v126_v36 = vunpack.c.l.bf16 %v124_v34  ;;  %v1148_v38 = vpop.eup %1147  ;;  %v1520_v34 = vpop.permute.xlu2 %298 }
  0xa3   :  { %v177_v37 = vrot.slane %v175_v35, 3  ;;  %v129_v42 = vpack.c.bf16 %v1148_v38, %v1148_v38 }
  0xa4   :  { %1100 = vset.pattern.permute.xlu1 %v1381_v13  ;;  %1149 = vtanh.f32 %v126_v36 }
  0xa5   :  { %v181_v39 = vsel %vm178_vm1, %v175_v35, %v177_v37  ;;  %v197_v48 = vunpack.c.l.bf16 %v129_v42 }
  0xa6   :  { %v1069_v40 = vpack.i.b16 %v181_v39, %v181_v39  ;;  %v184_v41 = vunpack.i.h.s16 %v181_v39 }
  0xa7   :  { %1107 = vset.pattern.permute.xlu2 %v1357_v1 }
  0xa8   :  { %v187_v43 = vperm.slane %v1069_v40, 0  ;;  %v186_v44 = vpack.i.b16 %v184_v41, %v184_v41 }
  0xaa   :  { %v1150_v45 = vpop.eup %1149  ;;  %v190_v46 = vpack.i.b16 %v187_v43, %v187_v43  ;;  %v188_v47 = vperm.slane %v186_v44, 0  ;;  %v1525_v36 = vpop.permute.xlu2 %354  ;;  %v1542_v43 = vperm.slane %v1365_v8, 7 }
  0xab   :  { %v130_v49 = vpack.c.bf16 %v1150_v45, %v1150_v45  ;;  %v1294_v45 = vmov 0  }
  0xac   :  { %448 = vperm.xlu1 %1100, %v1415_v18   ;;  %v192_v50 = vperm.slane %v190_v46, 0  ;;  %v194_v51 = vpack.i.b16 %v188_v47, %v188_v47 }
  0xad   :  { %v198_v54 = vunpack.c.l.bf16 %v130_v49 }
  0xae   :  { %v199_v52 = vunpack.c.l.bf16 %v192_v50  ;;  %v196_v53 = vperm.slane %v194_v51, 0  ;;  %v1489_v25 = vpop.permute.xlu1 %311 }
  0xaf   :  { %531 = vperm.xlu2 %1107, %v526_v3  }
  0xb0   :  { %v201_v55 = vmul.f32 %v199_v52, %v197_v48  ;;  %v200_v56 = vunpack.c.l.bf16 %v196_v53 }
  0xb2   :  { %v203_v57 = vpack.c.bf16 %v201_v55, %v201_v55  ;;  %v202_v58 = vmul.f32 %v200_v56, %v198_v54  ;;  %v1530_v38 = vpop.permute.xlu2 %366 }
  0xb4   :  { %1102 = vset.pattern.permute.xlu1 %v1390_v15  ;;  %v205_v59 = vunpack.c.l.bf16 %v203_v57  ;;  %v204_v61 = vpack.c.bf16 %v202_v58, %v202_v58 }
  0xb6   :  { %v207_v60 = vsel %vm105_vm0, %v205_v59, 0.0  ;;  %v206_v62 = vunpack.c.l.bf16 %v204_v61 }
  0xb7   :  { %208 = vadd.xlane.f32.xlu0 %v207_v60  ;;  %1109 = vset.pattern.permute.xlu2 %v1390_v15 }
  0xb8   :  { %v210_v2 = vsel %vm105_vm0, %v206_v62, 0.0 }
  0xba   :  { %v1535_v40 = vpop.permute.xlu2 %385 }
  0xbc   :  { %467 = vperm.xlu1 %1102, %v1431_v28  }
  0xbe   :  { %v1493_v26 = vpop.permute.xlu1 %317 }
  0xbf   :  { %211 = vadd.xlane.f32.xlu0 %v210_v2  ;;  %543 = vperm.xlu2 %1109, %v526_v3  }
  0xc2   :  { %v1539_v42 = vpop.permute.xlu2 %397 }
  0xc4   :  { %1104 = vset.pattern.permute.xlu1 %v1357_v1 }
  0xc7   :  { %1112 = vset.pattern.permute.xlu2 %v1376_v12 }
  0xca   :  { %v1548_v46 = vpop.permute.xlu2 %442 }
  0xcc   :  { %506 = vperm.xlu1 %1104, %v501_v63  }
  0xce   :  { %v1497_v27 = vpop.permute.xlu1 %329 }
  0xcf   :  { %588 = vperm.xlu2 %1112, %v577_v4  }
  0xd3   :  { %304 = vperm.xlu0 %1087, %v1368_v9  }
  0xd4   :  { %1106 = vset.pattern.permute.xlu1 %v1381_v13 }
  0xd7   :  { %1114 = vset.pattern.permute.xlu2 %v1381_v13 }
  0xd9   :  { %v1553_v48 = vpop.permute.xlu2 %455 }
  0xdb   :  { %372 = vperm.xlu0 %1087, %v1399_v16  }
  0xdc   :  { %524 = vperm.xlu1 %1106, %v501_v63  }
  0xde   :  { %v1503_v30 = vpop.permute.xlu1 %360 }
  0xdf   :  { %600 = vperm.xlu2 %1114, %v577_v4  }
  0xe3   :  { %549 = vperm.xlu0 %1087, %v526_v3  }
  0xe4   :  { %1108 = vset.pattern.permute.xlu1 %v1376_v12 }
  0xe7   :  { %1116 = vset.pattern.permute.xlu2 %v1390_v15 }
  0xe9   :  { %v1557_v50 = vpop.permute.xlu2 %473 }
  0xeb   :  { %1110 = vset.pattern.permute.xlu0 %v1390_v15 }
  0xec   :  { %537 = vperm.xlu1 %1108, %v526_v3  }
  0xef   :  { %619 = vperm.xlu2 %1116, %v602_v5  }
  0xf3   :  { %323 = vperm.xlu0 %1110, %v1386_v14   ;;  %v1473_v14 = vand.u32 127, %v219_v0 }
  0xf4   :  { %1111 = vset.pattern.permute.xlu1 %v1357_v1 }
  0xf5   :  { %1927 = vst [vmem:[#allocation16_spill] sm:$0xff] %v1473_v14 }
  0xf7   :  { %1118 = vset.pattern.permute.xlu2 %v1357_v1 }
  0xf9   :  { %v1560_v55 = vpop.permute.xlu2 %512 }
  0xfb   :  { %518 = vperm.xlu0 %1110, %v501_v63  }
  0xfc   :  { %582 = vperm.xlu1 %1111, %v577_v4  }
  0xff   :  { %658 = vperm.xlu2 %1118, %v1463_v6  }
 0x103   :  { %695 = vperm.xlu0 %1110, %v1483_v23  }
 0x104   :  { %1113 = vset.pattern.permute.xlu1 %v1390_v15 }
 0x107   :  { %1121 = vset.pattern.permute.xlu2 %v1381_v13 }
 0x109   :  { %v1562_v58 = vpop.permute.xlu2 %531 }
 0x10b   :  { %1124 = vset.pattern.permute.xlu0 %v1357_v1 }
 0x10c   :  { %594 = vperm.xlu1 %1113, %v577_v4  }
 0x10f   :  { %676 = vperm.xlu2 %1121, %v1463_v6  }
 0x113   :  { %430 = vperm.xlu0 %1124, %v1415_v18   ;;  %v1511_v18 = vpop.permute.xlu1 %379 }
 0x114   :  { %1115 = vset.pattern.permute.xlu1 %v1376_v12 }
 0x117   :  { %1123 = vset.pattern.permute.xlu2 %v1376_v12 }
 0x119   :  { %v1570_v61 = vpop.permute.xlu2 %543 }
 0x11a   :  { %1929 = vst [vmem:[#allocation18_spill] sm:$0xff] %v1570_v61 }
 0x11b   :  { %607 = vperm.xlu0 %1124, %v602_v5   ;;  %v1514_v32 = vpop.permute.xlu1 %391 }
 0x11f   :  { %689 = vperm.xlu2 %1123, %v1483_v23  }
 0x123   :  { %759 = vperm.xlu0 %1124, %v1506_v31   ;;  %v1517_v33 = vpop.permute.xlu1 %436 }
 0x127   :  { %1126 = vset.pattern.permute.xlu2 %v1357_v1 }
 0x129   :  { %v1574_v62 = vpop.permute.xlu2 %588 }
 0x12a   :  { %v209_v9 = vpop.xlane.xlu0 %208 }
 0x12b   :  { %v1475_v16 = vadd.f32 %v214_v11, %v209_v9  ;;  %v1522_v35 = vpop.permute.xlu1 %448 }
 0x12d   :  { %v221_v21 = vperm.slane %v1475_v16, %v1473_v14 }
 0x12f   :  { %734 = vperm.xlu2 %1126, %v1501_v29  }
 0x132   :  { %v212_v17 = vpop.xlane.xlu0 %211 }
 0x133   :  { %v216_v19 = vadd.f32 %v214_v11, %v212_v17  ;;  %v1527_v37 = vpop.permute.xlu1 %467 }
 0x134   :  { %1928 = vst [vmem:[#allocation17_spill] sm:$0xff] %v1527_v37 }
 0x135   :  { %v222_v22 = vperm.slane %v216_v19, %v1473_v14 }
 0x137   :  { %v224_v24 = vsel %vm223_vm2, %v222_v22, %v221_v21  ;;  %1128 = vset.pattern.permute.xlu2 %v1390_v15 }
 0x138   :  { %v227_v0 = vsel %vm226_vm3, %v224_v24, -inf }
 0x139   :  { %228 = vmax.xlane.f32.xlu1 %v227_v0  ;;  %v1578_v63 = vpop.permute.xlu2 %600 }
 0x13e   :  { %v1532_v39 = vpop.permute.xlu1 %506 }
 0x13f   :  { %746 = vperm.xlu2 %1128, %v1501_v29  }
 0x147   :  { %771 = vperm.xlu2 %1128, %v1506_v31  }
 0x149   :  { %v1582_v2 = vpop.permute.xlu2 %619 }
 0x14a   :  { %1930 = vst [vmem:[#allocation19_spill] sm:$0xff] %v1582_v2 }
 0x14e   :  { %v1537_v41 = vpop.permute.xlu1 %524 }
 0x14f   :  { %1130 = vset.pattern.permute.xlu2 %v1381_v13 }
 0x152   :  { %613 = vperm.xlu1 %1115, %v602_v5  }
 0x157   :  { %777 = vperm.xlu2 %1130, %v1506_v31  }
 0x159   :  { %v1585_v3 = vpop.permute.xlu2 %658 }
 0x15a   :  { %1117 = vset.pattern.permute.xlu1 %v1381_v13  ;;  %1931 = vst [vmem:[#allocation20_spill] sm:$0xff] %v1585_v3 }
 0x15e   :  { %v1545_v44 = vpop.permute.xlu1 %537 }
 0x15f   :  { %1133 = vset.pattern.permute.xlu2 %v1357_v1 }
 0x162   :  { %625 = vperm.xlu1 %1117, %v602_v5  }
 0x167   :  { %835 = vperm.xlu2 %1133, %v1542_v43  }
 0x169   :  { %v1588_v4 = vpop.permute.xlu2 %676 }
 0x16a   :  { %1119 = vset.pattern.permute.xlu1 %v1294_v45 }
 0x16e   :  { %v1551_v47 = vpop.permute.xlu1 %582 }
 0x16f   :  { %1135 = vset.pattern.permute.xlu2 %v1294_v45 }
 0x179   :  { %v1591_v5 = vpop.permute.xlu2 %689 }
 0x17e   :  { %v1555_v49 = vpop.permute.xlu1 %594 }
 0x189   :  { %v1595_v9 = vpop.permute.xlu2 %734 }
 0x18a   :  { %1932 = vst [vmem:[#allocation21_spill] sm:$0xff] %v1595_v9 }
 0x199   :  { %v1599_v11 = vpop.permute.xlu2 %746 }
 0x1ac   :  { %v229_v8 = vpop.xlane.xlu1 %228 }
 0x1ad   :  { %v231_v51 = vperm.slane %v229_v8, 0  ;;  %v232_v52 = vperm.slane %v229_v8, 1 }
 0x1af   :  { %v235_v53 = vsub.f32 %v1475_v16, %v231_v51  ;;  %v236_v54 = vsub.f32 %v216_v19, %v232_v52  ;;  %v1604_v16 = vpop.permute.xlu2 %771 }
 0x1b0   :  { %1933 = vst [vmem:[#allocation22_spill] sm:$0xff] %v1604_v16 }
 0x1b1   :  { %v237_v56 = vmul.f32 1.442695, %v235_v53  ;;  %v239_v57 = vmul.f32 1.442695, %v236_v54 }
 0x1b3   :  { %1151 = vpow2.f32 %v237_v56 }
 0x1b4   :  { %1153 = vpow2.f32 %v239_v57 }
 0x1b9   :  { %v1564_v59 = vpop.eup %1151 }
 0x1ba   :  { %v1566_v60 = vpop.eup %1153  ;;  %244 = vperm.xlu1 %1119, %v1564_v59  }
 0x1bb   :  { %247 = vperm.xlu2 %1135, %v1566_v60  }
 0x1c2   :  { %1120 = vset.pattern.permute.xlu1 %v1390_v15 }
 0x1c3   :  { %1136 = vset.pattern.permute.xlu2 %v1390_v15 }
 0x1c4   :  { %v1611_v17 = vpop.permute.xlu1 %613 }
 0x1ca   :  { %670 = vperm.xlu1 %1120, %v1463_v6  }
 0x1cb   :  { %847 = vperm.xlu2 %1136, %v1542_v43  }
 0x1d2   :  { %1122 = vset.pattern.permute.xlu1 %v1357_v1  ;;  %v805_v1 = vperm.slane %v1363_v7, 7  ;;  %v1608_v7 = vpop.permute.xlu2 %777 }
 0x1d3   :  { %1138 = vset.pattern.permute.xlu2 %v1381_v13  ;;  %1934 = vst [vmem:[#allocation23_spill] sm:$0xff] %v1608_v7 }
 0x1d4   :  { %810 = vperm.xlu0 %1124, %v805_v1  }
 0x1da   :  { %683 = vperm.xlu1 %1122, %v1483_v23   ;;  %v1614_v19 = vpop.permute.xlu2 %835 }
 0x1db   :  { %1935 = vst [vmem:[#allocation24_spill] sm:$0xff] %v1614_v19 }
 0x1dc   :  { %1131 = vset.pattern.permute.xlu0 %v1376_v12 }
 0x1e2   :  { %1125 = vset.pattern.permute.xlu1 %v1381_v13 }
 0x1e4   :  { %461 = vperm.xlu0 %1131, %v1431_v28   ;;  %v1617_v28 = vpop.permute.xlu1 %625 }
 0x1e5   :  { %1936 = vst [vmem:[#allocation25_spill] sm:$0xff] %v1617_v28 }
 0x1ea   :  { %701 = vperm.xlu1 %1125, %v1483_v23  }
 0x1ec   :  { %664 = vperm.xlu0 %1131, %v1463_v6  }
 0x1f2   :  { %1127 = vset.pattern.permute.xlu1 %v1376_v12 }
 0x1f4   :  { %841 = vperm.xlu0 %1131, %v1542_v43  }
 0x1fa   :  { %740 = vperm.xlu1 %1127, %v1501_v29  }
 0x1fc   :  { %1139 = vset.pattern.permute.xlu0 %v1294_v45 }
 0x202   :  { %765 = vperm.xlu1 %1127, %v1506_v31  }
 0x20a   :  { %1129 = vset.pattern.permute.xlu1 %v1381_v13 }
 0x212   :  { %752 = vperm.xlu1 %1129, %v1501_v29  }
 0x215   :  { %v248_v21 = vpop.permute.xlu2 %247 }
 0x216   :  { %v250_v22 = vperm.slane %v248_v21, %v1473_v14 }
 0x21a   :  { %1132 = vset.pattern.permute.xlu1 %v1376_v12  ;;  %v1628_v12 = vpop.permute.xlu0 %304 }
 0x222   :  { %816 = vperm.xlu1 %1132, %v805_v1  }
 0x22a   :  { %1134 = vset.pattern.permute.xlu1 %v1390_v15  ;;  %v1630_v15 = vpop.permute.xlu0 %372 }
 0x22c   :  { %v245_v6 = vpop.permute.xlu1 %244 }
 0x22d   :  { %v249_v23 = vperm.slane %v245_v6, %v1473_v14 }
 0x22f   :  { %v251_v24 = vsel %vm223_vm2, %v250_v22, %v249_v23 }
 0x230   :  { %v253_v0 = vsel %vm226_vm3, %v251_v24, 0.0 }
 0x231   :  { %254 = vadd.xlane.f32.xlu2 %v253_v0 }
 0x232   :  { %822 = vperm.xlu1 %1134, %v805_v1   ;;  %v1632_v29 = vpop.permute.xlu0 %549 }
 0x23a   :  { %1137 = vset.pattern.permute.xlu1 %v1381_v13  ;;  %v1634_v31 = vpop.permute.xlu0 %323 }
 0x23c   :  { %v671_v52 = vpop.permute.xlu1 %670 }
 0x242   :  { %828 = vperm.xlu1 %1137, %v805_v1   ;;  %v519_v8 = vpop.permute.xlu0 %518 }
 0x249   :  { %853 = vperm.xlu2 %1138, %v1542_v43  }
 0x24a   :  { %1140 = vset.pattern.permute.xlu1 %v1294_v45  ;;  %v1636_v51 = vpop.permute.xlu0 %695 }
 0x24b   :  { %1937 = vst [vmem:[#allocation26_spill] sm:$0xff] %v1636_v51 }
 0x24c   :  { %v1640_v53 = vpop.permute.xlu1 %683 }
 0x251   :  { %1141 = vset.pattern.permute.xlu2 %v1294_v45  ;;  %v1646_v45 = vpop.permute.xlu2 %847 }
 0x252   :  { %v1638_v13 = vpop.permute.xlu0 %430  ;;  %1939 = vst [vmem:[#allocation28_spill] sm:$0xff] %v1646_v45 }
 0x25a   :  { %v1644_v54 = vpop.permute.xlu0 %607 }
 0x25c   :  { %v1642_v43 = vpop.permute.xlu1 %701 }
 0x25d   :  { %1938 = vst [vmem:[#allocation27_spill] sm:$0xff] %v1642_v43 }
 0x262   :  { %v1648_v57 = vpop.permute.xlu0 %759 }
 0x26a   :  { %v1652_v22 = vpop.permute.xlu0 %810 }
 0x26b   :  { %1940 = vst [vmem:[#allocation29_spill] sm:$0xff] %v1652_v22 }
 0x26c   :  { %v741_v56 = vpop.permute.xlu1 %740 }
 0x274   :  { %v1650_v6 = vpop.permute.xlu1 %765 }
 0x284   :  { %v1669_v43 = vpop.permute.xlu1 %752 }
 0x285   :  { %1941 = vst [vmem:[#allocation30_spill] sm:$0xff] %v1669_v43 }
 0x294   :  { %v817_v61 = vpop.permute.xlu1 %816 }
 0x2a4   :  { %v255_v1 = vpop.xlane.xlu2 %254 }
 0x2a5   :  { %1155 = vrcp.f32 %v255_v1 }
 0x2ab   :  { %v1156_v21 = vpop.eup %1155 }
 0x2ac   :  { %v258_v23 = vperm.slane %v1156_v21, 0  ;;  %v259_v24 = vperm.slane %v1156_v21, 1 }
 0x2ae   :  { %v262_v0 = vmul.f32 %v1564_v59, %v258_v23  ;;  %v1656_v14 = vmul.f32 %v1566_v60, %v259_v24  ;;  %v462_v60 = vpop.permute.xlu0 %461 }
 0x2b0   :  { %v1658_v7 = vperm.slane %v262_v0, 0  ;;  %v1660_v45 = vperm.slane %v262_v0, 1  ;;  %v1662_v16 = vperm.slane %v262_v0, 2  ;;  %270 = vperm.xlu1 %1140, %v1656_v14   ;;  %267 = vperm.xlu0 %1139, %v262_v0   ;;  %v1671_v59 = vperm.slane %v262_v0, 3 }
 0x2b1   :  { %v1684_v9 = vperm.slane %v1656_v14, 0 }
 0x2b2   :  { %v340_v1 = vmul.f32 %v1477_v20, %v1658_v7  ;;  %v408_v21 = vmul.f32 %v1503_v30, %v1660_v45  ;;  %v484_v24 = vmul.f32 %v1517_v33, %v1662_v16  ;;  %v341_v51 = vmul.f32 %v1520_v34, %v1658_v7 }
 0x2b3   :  { %v409_v22 = vmul.f32 %v1530_v38, %v1660_v45  ;;  %v560_v20 = vmul.f32 %v1560_v55, %v1671_v59  ;;  %v1681_v30 = vperm.slane %v262_v0, 4  ;;  %v485_v34 = vmul.f32 %v1548_v46, %v1662_v16 }
 0x2b4   :  { %v416_v23 = vadd.f32 %v408_v21, %v340_v1  ;;  %v1687_v1 = vperm.slane %v1656_v14, 1  ;;  %v1691_v21 = vperm.slane %v262_v0, 7  ;;  %v1693_v38 = vperm.slane %v262_v0, 5 }
 0x2b5   :  { %v417_v43 = vadd.f32 %v409_v22, %v341_v51  ;;  %v636_v55 = vmul.f32 %v1574_v62, %v1681_v30  ;;  %v1700_v51 = vperm.slane %v262_v0, 6  ;;  %v561_v0 = vmul.f32 %v519_v8, %v1671_v59 }
 0x2b6   :  { %v492_v2 = vadd.f32 %v484_v24, %v416_v23  ;;  %1942 = vst [vmem:[#allocation31_spill] sm:$0xff] %v1691_v21  ;;  %v1696_v23 = vperm.slane %v1656_v14, 2  ;;  %v344_v24 = vmul.f32 %v1493_v26, %v1684_v9  ;;  %v414_v46 = vmul.f32 %v1539_v42, %v1687_v1 }
 0x2b7   :  { %v493_v22 = vadd.f32 %v485_v34, %v417_v43  ;;  %v412_v28 = vmul.f32 %v1535_v40, %v1687_v1  ;;  %v864_v43 = vmul.f32 %v817_v61, %v1691_v21  ;;  %v665_v34 = vpop.permute.xlu0 %664  ;;  %v1716_v26 = vperm.slane %v1656_v14, 4 }
 0x2b8   :  { %v568_v33 = vadd.f32 %v560_v20, %v492_v2  ;;  %v346_v2 = vmul.f32 %v1497_v27, %v1684_v9  ;;  %v1709_v20 = vperm.slane %v1656_v14, 3  ;;  %v488_v3 = vmul.f32 %v462_v60, %v1696_v23 }
 0x2b9   :  { %v420_v27 = vadd.f32 %v412_v28, %v344_v24  ;;  %v788_v42 = vmul.f32 %v741_v56, %v1700_v51  ;;  %v712_v19 = vmul.f32 %v665_v34, %v1693_v38  ;;  %v637_v40 = vmul.f32 %v1555_v49, %v1681_v30 }
 0x2ba   :  { %v644_v62 = vadd.f32 %v636_v55, %v568_v33  ;;  %v569_v37 = vadd.f32 %v561_v0, %v493_v22  ;;  %v713_v33 = vmul.f32 %v671_v52, %v1693_v38  ;;  %v422_v8 = vadd.f32 %v414_v46, %v346_v2 }
 0x2bb   :  { %v496_v55 = vadd.f32 %v488_v3, %v420_v27  ;;  %v564_v61 = vmul.f32 %v1545_v44, %v1709_v20  ;;  %v1728_v28 = vmul.f32 %v1599_v11, %v1700_v51  ;;  %v1731_v56 = vperm.slane %v1656_v14, 5 }
 0x2bc   :  { %v720_v21 = vadd.f32 %v712_v19, %v644_v62  ;;  %v342_v60 = vmul.f32 %v1628_v12, %v1658_v7  ;;  %v490_v49 = vmul.f32 %v1557_v50, %v1696_v23  ;;  %v640_v3 = vmul.f32 %v1611_v17, %v1716_v26 }
 0x2bd   :  { %v572_v52 = vadd.f32 %v564_v61, %v496_v55  ;;  %v410_v44 = vmul.f32 %v1630_v15, %v1660_v45  ;;  %v645_v19 = vadd.f32 %v637_v40, %v569_v37  ;;  %v1742_v11 = vperm.slane %v1656_v14, 6 }
 0x2be   :  { %v343_v22 = vmul.f32 %v1489_v25, %v1684_v9  ;;  %v411_v12 = vmul.f32 %v1511_v18, %v1687_v1  ;;  %v498_v24 = vadd.f32 %v490_v49, %v422_v8  ;;  %v486_v50 = vmul.f32 %v1522_v35, %v1662_v16  ;;  %v823_v8 = vpop.permute.xlu1 %822 }
 0x2bf   :  { %v648_v2 = vadd.f32 %v640_v3, %v572_v52  ;;  %v418_v46 = vadd.f32 %v410_v44, %v342_v60  ;;  %v796_v17 = vadd.f32 %v788_v42, %v720_v21  ;;  %v566_v15 = vmul.f32 %v1632_v29, %v1709_v20 }
 0x2c0   :  { %v419_v37 = vadd.f32 %v411_v12, %v343_v22  ;;  %v487_v62 = vmul.f32 %v1553_v48, %v1696_v23  ;;  %v716_v25 = vmul.f32 %v1591_v5, %v1731_v56  ;;  %v562_v18 = vmul.f32 %v1537_v41, %v1671_v59 }
 0x2c1   :  { %v494_v0 = vadd.f32 %v486_v50, %v418_v46  ;;  %v339_v34 = vmul.f32 %v1466_v10, %v1658_v7  ;;  %v1761_v35 = vperm.slane %v1656_v14, 7  ;;  %v563_v29 = vmul.f32 %v1562_v58, %v1709_v20  ;;  %v1947_v50 = vld [vmem:[#allocation25_spill] sm:$0xff] }
 0x2c2   :  { %v495_v21 = vadd.f32 %v487_v62, %v419_v37  ;;  %v407_v48 = vmul.f32 %v1525_v36, %v1660_v45  ;;  %v721_v27 = vadd.f32 %v713_v33, %v645_v19  ;;  %v574_v42 = vadd.f32 %v566_v15, %v498_v24  ;;  %v842_v33 = vpop.permute.xlu0 %841  ;;  %v1948_v15 = vld [vmem:[#allocation21_spill] sm:$0xff] }
 0x2c3   :  { %v724_v5 = vadd.f32 %v716_v25, %v648_v2  ;;  %v570_v40 = vadd.f32 %v562_v18, %v494_v0  ;;  %v639_v55 = vmul.f32 %v1644_v54, %v1716_v26  ;;  %v483_v14 = vmul.f32 %v1638_v13, %v1662_v16  ;;  %v1946_v2 = vld [vmem:[#allocation18_spill] sm:$0xff]  ;;  %v1950_v0 = vld [vmem:[#allocation19_spill] sm:$0xff] }
 0x2c4   :  { %v571_v41 = vadd.f32 %v563_v29, %v495_v21  ;;  %v415_v10 = vadd.f32 %v407_v48, %v339_v34  ;;  %v792_v7 = vmul.f32 %v1650_v6, %v1742_v11  ;;  %v638_v58 = vmul.f32 %v1578_v63, %v1681_v30 }
 0x2c5   :  { %v715_v36 = vmul.f32 %v1640_v53, %v1731_v56  ;;  %v1777_v45 = vadd.f32 %v864_v43, %v796_v17  ;;  %v559_v54 = vmul.f32 %v1532_v39, %v1671_v59  ;;  %v345_v16 = vmul.f32 %v1634_v31, %v1684_v9  ;;  %v1943_v59 = vld [vmem:[#allocation17_spill] sm:$0xff] }
 0x2c6   :  { %v647_v61 = vadd.f32 %v639_v55, %v571_v41  ;;  %v491_v60 = vadd.f32 %v483_v14, %v415_v10  ;;  %v800_v13 = vadd.f32 %v792_v7, %v724_v5  ;;  %v646_v49 = vadd.f32 %v638_v58, %v570_v40  ;;  %v1951_v5 = vld [vmem:[#allocation31_spill] sm:$0xff]  ;;  %v1952_v40 = vld [vmem:[#allocation29_spill] sm:$0xff] }
 0x2c7   :  { %v880_v6 = vmul.f32 %v1777_v45, %v1777_v45  ;;  %v413_v63 = vmul.f32 %v1514_v32, %v1687_v1  ;;  %v791_v43 = vmul.f32 %v1648_v57, %v1742_v11  ;;  %v635_v3 = vmul.f32 %v1551_v47, %v1681_v30  ;;  %v1944_v32 = vld [vmem:[#allocation24_spill] sm:$0xff] }
 0x2c8   :  { %v723_v53 = vadd.f32 %v715_v36, %v647_v61  ;;  %v567_v52 = vadd.f32 %v559_v54, %v491_v60  ;;  %v868_v39 = vmul.f32 %v842_v33, %v1761_v35  ;;  %v714_v9 = vmul.f32 %v1588_v4, %v1693_v38  ;;  %v1945_v57 = vld [vmem:[#allocation20_spill] sm:$0xff]  ;;  %v1955_v33 = vld [vmem:[#allocation22_spill] sm:$0xff] }
 0x2c9   :  { %899 = vperm.xlu1 %1140, %v880_v6   ;;  %v421_v31 = vadd.f32 %v413_v63, %v345_v16  ;;  %v489_v44 = vmul.f32 %v1943_v59, %v1696_v23  ;;  %v867_v1 = vmul.f32 %v1944_v32, %v1761_v35  ;;  %v711_v12 = vmul.f32 %v1945_v57, %v1693_v38  ;;  %v1949_v38 = vld [vmem:[#allocation30_spill] sm:$0xff]  ;;  %v1957_v6 = vld [vmem:[#allocation28_spill] sm:$0xff] }
 0x2ca   :  { %v799_v19 = vadd.f32 %v791_v43, %v723_v53  ;;  %v643_v22 = vadd.f32 %v635_v3, %v567_v52  ;;  %v1800_v24 = vadd.f32 %v868_v39, %v800_v13  ;;  %v722_v47 = vadd.f32 %v714_v9, %v646_v49  ;;  %v854_v53 = vpop.permute.xlu2 %853  ;;  %v1958_v32 = vld [vmem:[#allocation16_spill] sm:$0xff] }
 0x2cb   :  { %v497_v30 = vadd.f32 %v489_v44, %v421_v31  ;;  %v565_v4 = vmul.f32 %v1946_v2, %v1709_v20  ;;  %v642_v46 = vmul.f32 %v1947_v50, %v1716_v26  ;;  %v787_v37 = vmul.f32 %v1948_v15, %v1700_v51  ;;  %v829_v20 = vpop.permute.xlu1 %828 }
 0x2cc   :  { %v1806_v17 = vadd.f32 %v867_v1, %v799_v19  ;;  %v719_v23 = vadd.f32 %v711_v12, %v643_v22  ;;  %v797_v62 = vadd.f32 %v1728_v28, %v721_v27  ;;  %v790_v25 = vmul.f32 %v1949_v38, %v1700_v51  ;;  %v1953_v28 = vld [vmem:[#allocation26_spill] sm:$0xff] }
 0x2cd   :  { %v573_v18 = vadd.f32 %v565_v4, %v497_v30  ;;  %v641_v34 = vmul.f32 %v1950_v0, %v1716_v26  ;;  %v650_v21 = vadd.f32 %v642_v46, %v574_v42  ;;  %v863_v41 = vmul.f32 %v1952_v40, %v1951_v5  ;;  %v1954_v26 = vld [vmem:[#allocation27_spill] sm:$0xff] }
 0x2ce   :  { %v883_v29 = vmul.f32 %v1806_v17, %v1806_v17  ;;  %v795_v48 = vadd.f32 %v787_v37, %v719_v23  ;;  %v798_v55 = vadd.f32 %v790_v25, %v722_v47  ;;  %v717_v27 = vmul.f32 %v1953_v28, %v1731_v56 }
 0x2cf   :  { %v649_v10 = vadd.f32 %v641_v34, %v573_v18  ;;  %v884_v51 = vmul.f32 %v1800_v24, %v1800_v24  ;;  %v865_v14 = vmul.f32 %v823_v8, %v1951_v5  ;;  %v718_v42 = vmul.f32 %v1954_v26, %v1731_v56  ;;  %v1956_v56 = vld [vmem:[#allocation23_spill] sm:$0xff] }
 0x2d0   :  { %908 = vperm.xlu2 %1141, %v883_v29   ;;  %v1826_v7 = vadd.f32 %v863_v41, %v795_v48  ;;  %v866_v58 = vmul.f32 %v829_v20, %v1951_v5  ;;  %v793_v61 = vmul.f32 %v1955_v33, %v1742_v11  ;;  %v794_v49 = vmul.f32 %v1956_v56, %v1742_v11 }
 0x2d1   :  { %v725_v36 = vadd.f32 %v717_v27, %v649_v10  ;;  %911 = vperm.xlu1 %1140, %v884_v51   ;;  %v1831_v60 = vadd.f32 %v865_v14, %v797_v62  ;;  %v726_v54 = vadd.f32 %v718_v42, %v650_v21  ;;  %v869_v63 = vmul.f32 %v1957_v6, %v1761_v35 }
 0x2d2   :  { %v879_v16 = vmul.f32 %v1826_v7, %v1826_v7  ;;  %v1835_v8 = vadd.f32 %v866_v58, %v798_v55  ;;  %v870_v9 = vmul.f32 %v854_v53, %v1761_v35  ;;  %v1859_v2 = vadd.s32 4294967288, %v1958_v32 }
 0x2d3   :  { %v801_v13 = vadd.f32 %v793_v61, %v725_v36  ;;  %v802_v43 = vadd.f32 %v794_v49, %v726_v54  ;;  %v881_v52 = vmul.f32 %v1831_v60, %v1831_v60  ;;  %v1864_v23 = vadd.s32 4294967280, %v1958_v32 }
 0x2d4   :  { %896 = vperm.xlu0 %1139, %v879_v16   ;;  %v882_v39 = vmul.f32 %v1835_v8, %v1835_v8  ;;  %v1867_v15 = vadd.s32 4294967272, %v1958_v32 }
 0x2d5   :  { %v1843_v3 = vadd.f32 %v869_v63, %v801_v13  ;;  %v1848_v31 = vadd.f32 %v870_v9, %v802_v43 }
 0x2d7   :  { %v885_v11 = vmul.f32 %v1843_v3, %v1843_v3  ;;  %v886_v59 = vmul.f32 %v1848_v31, %v1848_v31 }
 0x2d8   :  { %902 = vperm.xlu2 %1141, %v881_v52  }
 0x2d9   :  { %905 = vperm.xlu1 %1140, %v882_v39  }
 0x2dc   :  { %914 = vperm.xlu0 %1139, %v885_v11  }
 0x2e0   :  { %917 = vperm.xlu2 %1141, %v886_v59  }
 0x322   :  { %v271_v44 = vpop.permute.xlu1 %270  ;;  %v268_v19 = vpop.permute.xlu0 %267 }
 0x323   :  { %v273_v1 = vperm.slane %v271_v44, %v1958_v32  ;;  %v272_v22 = vperm.slane %v268_v19, %v1958_v32 }
 0x325   :  { %v274_v35 = vsel %vm223_vm2, %v273_v1, %v272_v22 }
 0x326   :  { %276 = vst.msk [vmem:[#allocation10] sm:$0x3] %vm226_vm3, %v274_v35 }
 0x327   :  { %1038 = dma.vmem_to_hbm [thread:$0]  %s1034_s7, 32, %s1036_s13, [#allocation11]  }
 0x32a   :  { %v909_v57 = vpop.permute.xlu2 %908 }
 0x32b   :  { %v932_v38 = vperm.slane %v909_v57, %v1958_v32 }
 0x332   :  { %v903_v47 = vpop.permute.xlu2 %902 }
 0x333   :  { %v925_v0 = vperm.slane %v903_v47, %v1864_v23 }
 0x33a   :  { %v918_v34 = vpop.permute.xlu2 %917 }
 0x33b   :  { %v900_v12 = vpop.permute.xlu1 %899  ;;  %v937_v5 = vperm.slane %v918_v34, %v1867_v15 }
 0x33c   :  { %v921_v50 = vperm.slane %v900_v12, %v1859_v2 }
 0x343   :  { %v912_v30 = vpop.permute.xlu1 %911 }
 0x344   :  { %v933_v37 = vperm.slane %v912_v30, %v1859_v2 }
 0x346   :  { %v897_v4 = vpop.permute.xlu0 %896  ;;  %v934_v21 = vsel %vm922_vm4, %v933_v37, %v932_v38 }
 0x347   :  { %v919_v46 = vperm.slane %v897_v4, %v1958_v32 }
 0x349   :  { %v923_v25 = vsel %vm922_vm4, %v921_v50, %v919_v46 }
 0x34a   :  { %v927_v48 = vsel %vm926_vm5, %v925_v0, %v923_v25 }
 0x34b   :  { %v906_v62 = vpop.permute.xlu1 %905 }
 0x34c   :  { %v929_v18 = vperm.slane %v906_v62, %v1867_v15 }
 0x34e   :  { %v915_v20 = vpop.permute.xlu0 %914  ;;  %v931_v40 = vsel %vm930_vm6, %v929_v18, %v927_v48 }
 0x34f   :  { %v935_v29 = vperm.slane %v915_v20, %v1864_v23 }
 0x351   :  { %v936_v41 = vsel %vm926_vm5, %v935_v29, %v934_v21 }
 0x352   :  { %v938_v55 = vsel %vm930_vm6, %v937_v5, %v936_v41 }
 0x353   :  { %v939_v10 = vsel %vm223_vm2, %v938_v55, %v931_v40 }
 0x354   :  { %v942_v28 = vsel %vm941_vm7, %v939_v10, 0.0 }
 0x355   :  { %943 = vadd.xlane.f32.xlu0 %v942_v28 }
 0x3c8   :  { %v944_v27 = vpop.xlane.xlu0 %943 }
 0x3c9   :  { %1157 = vrsqrt.f32 %v944_v27  ;;  %vm951_vm9 = vweird.f32 %v944_v27 }
 0x3cf   :  { %v1158_v51 = vpop.eup %1157 }
 0x3d0   :  { %v946_v14 = vmul.f32 %v1158_v51, %v944_v27  ;;  %vm952_vm8 = vweird.f32 %v1158_v51 }
 0x3d1   :  { %vm953_vm10 = vmor %vm951_vm9, %vm952_vm8 }
 0x3d2   :  { %v947_v26 = vmul.f32 %v1158_v51, %v946_v14 }
 0x3d4   :  { %v948_v42 = vmul.f32 0.5, %v947_v26 }
 0x3d6   :  { %v949_v58 = vsub.f32 1.5, %v948_v42 }
 0x3d8   :  { %v950_v36 = vmul.f32 %v1158_v51, %v949_v58 }
 0x3da   :  { %v954_v33 = vsel %vm953_vm10, %v1158_v51, %v950_v36 }
 0x3db   :  { %v956_v61 = vperm.slane %v954_v33, 0  ;;  %v957_v13 = vperm.slane %v954_v33, 1 }
 0x3dd   :  { %v961_v54 = vmul.f32 %v956_v61, %v1777_v45  ;;  %v960_v16 = vmul.f32 %v956_v61, %v1826_v7  ;;  %v965_v56 = vmul.f32 %v957_v13, %v1800_v24  ;;  %v964_v49 = vmul.f32 %v957_v13, %v1806_v17 }
 0x3de   :  { %v966_v6 = vmul.f32 %v957_v13, %v1843_v3  ;;  %v962_v63 = vmul.f32 %v956_v61, %v1831_v60  ;;  %v967_v45 = vmul.f32 %v957_v13, %v1848_v31  ;;  %v963_v24 = vmul.f32 %v956_v61, %v1835_v8 }
 0x3df   :  { %980 = vperm.xlu2 %1141, %v961_v54   ;;  %977 = vperm.xlu1 %1140, %v960_v16  }
 0x3e7   :  { %992 = vperm.xlu2 %1141, %v965_v56   ;;  %989 = vperm.xlu1 %1140, %v964_v49  }
 0x3ef   :  { %995 = vperm.xlu2 %1141, %v966_v6   ;;  %983 = vperm.xlu1 %1140, %v962_v63  }
 0x3f7   :  { %998 = vperm.xlu2 %1141, %v967_v45   ;;  %986 = vperm.xlu1 %1140, %v963_v24  }
 0x439   :  { %v981_v17 = vpop.permute.xlu2 %980 }
 0x43a   :  { %v1001_v44 = vperm.slane %v981_v17, %v1859_v2 }
 0x441   :  { %v993_v60 = vpop.permute.xlu2 %992 }
 0x442   :  { %v1008_v39 = vperm.slane %v993_v60, %v1859_v2 }
 0x449   :  { %v996_v43 = vpop.permute.xlu2 %995 }
 0x44a   :  { %v1010_v31 = vperm.slane %v996_v43, %v1864_v23 }
 0x451   :  { %v978_v7 = vpop.permute.xlu1 %977  ;;  %v999_v59 = vpop.permute.xlu2 %998 }
 0x452   :  { %v1000_v9 = vperm.slane %v978_v7, %v1958_v32 }
 0x454   :  { %v1002_v22 = vsel %vm922_vm4, %v1001_v44, %v1000_v9 }
 0x459   :  { %v990_v53 = vpop.permute.xlu1 %989 }
 0x45a   :  { %v1007_v3 = vperm.slane %v990_v53, %v1958_v32  ;;  %v1012_v32 = vperm.slane %v999_v59, %v1867_v15 }
 0x45c   :  { %v1009_v11 = vsel %vm922_vm4, %v1008_v39, %v1007_v3 }
 0x45d   :  { %v1011_v19 = vsel %vm926_vm5, %v1010_v31, %v1009_v11 }
 0x45e   :  { %v1013_v47 = vsel %vm930_vm6, %v1012_v32, %v1011_v19 }
 0x461   :  { %v984_v52 = vpop.permute.xlu1 %983 }
 0x462   :  { %v1003_v8 = vperm.slane %v984_v52, %v1864_v23 }
 0x464   :  { %v1004_v57 = vsel %vm926_vm5, %v1003_v8, %v1002_v22 }
 0x469   :  { %v987_v1 = vpop.permute.xlu1 %986 }
 0x46a   :  { %v1005_v35 = vperm.slane %v987_v1, %v1867_v15 }
 0x46c   :  { %v1006_v12 = vsel %vm930_vm6, %v1005_v35, %v1004_v57 }
 0x46d   :  { %v1014_v30 = vsel %vm223_vm2, %v1013_v47, %v1006_v12 }
 0x46e   :  { %1016 = vst.msk [vmem:[#allocation9] sm:$0x3] %vm941_vm7, %v1014_v30 }
 0x46f   :  { %1027 = dma.vmem_to_hbm [thread:$0]  %s1023_s14, 32, %s1025_s17, [#allocation5]  }
 0x470   :  { %1283 = dma.done.wait [#allocation5], 32  }
 0x471   :  { %1284 = vsyncadd [#allocation5], 4294967264 }
 0x472   :  { %1285 = dma.done.wait [#allocation11], 32  }
 0x473   :  { %1286 = vsyncadd [#allocation11], 4294967264 }
 0x474   :  { %1047 = vsyncpa [#allocation4], 1 }
 0x475   :  { %1048 = vsyncpa [#allocation7], 1 }
 0x476   :  { %1049 = vsyncpa [#allocation5], 1 }
 0x477   :  { %1050 = vsyncpa [#allocation11], 1 }

</bundles_post_ra>
